<compile_context>
chip_gen: v7x
topology: tpu7x:2x2x1
jax: 0.10.0
libtpu: 0.0.40
codegen_flags: <defaults>
</compile_context>

<pallas_src>
import math
import numpy as np
import jax
import jax.numpy as jnp
from jax import lax
from jax.experimental import pallas as pl
from jax.experimental.pallas import tpu as pltpu


# --------------------------------------------------------------------------------------
# Parameter construction (mirrors SincConv.__init__, deterministic, no checkpoint load)
# --------------------------------------------------------------------------------------
def to_mel(hz):
    return 2595 * np.log10(1 + hz / 700)


def to_hz(mel):
    return 700 * (10 ** (mel / 2595) - 1)


def make_sinc_params(out_channels, kernel_size, sample_rate, min_low_hz, min_band_hz):
    if kernel_size % 2 == 0:
        kernel_size += 1
    low_hz = 30
    high_hz = sample_rate / 2 - (min_low_hz + min_band_hz)
    mel = np.linspace(to_mel(low_hz), to_mel(high_hz), out_channels + 1)
    hz = to_hz(mel)
    low_hz_ = jnp.asarray(hz[:-1].reshape(-1, 1), jnp.float32)          # (C, 1)
    band_hz_ = jnp.asarray(np.diff(hz).reshape(-1, 1), jnp.float32)     # (C, 1)
    n_lin = np.linspace(0, kernel_size / 2 - 1, int(kernel_size / 2))   # (K//2,)
    window_ = jnp.asarray(
        0.54 - 0.46 * np.cos(2 * math.pi * n_lin / kernel_size), jnp.float32
    )
    n = (kernel_size - 1) / 2.0
    n_ = jnp.asarray(
        2 * math.pi * np.arange(-n, 0).reshape(1, -1) / sample_rate, jnp.float32
    )                                                                   # (1, K//2)
    return low_hz_, band_hz_, window_, n_, kernel_size


def build_filters(low_hz_, band_hz_, window_, n_, sample_rate, min_low_hz, min_band_hz):
    """Mirrors the filter-building half of SincConv.forward (plain JAX glue)."""
    low = min_low_hz + jnp.abs(low_hz_)                                             # (C,1)
    high = jnp.clip(low + min_band_hz + jnp.abs(band_hz_), min_low_hz, sample_rate / 2)
    band = (high - low)[:, 0]                                                       # (C,)
    f_times_t_low = jnp.matmul(low, n_)                                             # (C,K//2)
    f_times_t_high = jnp.matmul(high, n_)
    band_pass_left = (jnp.sin(f_times_t_high) - jnp.sin(f_times_t_low)) / (n_ / 2) * window_
    band_pass_center = 2 * band[:, None]                                            # (C,1)
    band_pass_right = jnp.flip(band_pass_left, axis=1)
    band_pass = jnp.concatenate([band_pass_left, band_pass_center, band_pass_right], axis=1)
    band_pass = band_pass / (2 * band[:, None])
    return band_pass                                                                # (C, K)


# --------------------------------------------------------------------------------------
# Pallas kernel: valid 1-D conv, (B, T)-tiled grid, in-kernel patch build + MXU matmul
# --------------------------------------------------------------------------------------
def _round_up(x, m):
    return (x + m - 1) // m * m


def sinc_conv1d(x, filters, *, compute_dtype=jnp.bfloat16, t_tile=None,
                patch_mode="roll"):
    """x: (B, N) f32, filters: (C, K) f32 -> (B, C, N-K+1) f32."""
    B, N = x.shape
    C, K = filters.shape
    T = N - K + 1
    assert T >= 1, "input shorter than kernel"

    if t_tile is None:
        t_tile = min(512, _round_up(T, 128))     # lane-dense tiles, VMEM-safe on v7x
    t_tile = max(128, _round_up(t_tile, 128))
    K_pad = _round_up(K, 128)                    # contraction dim, multiple of 128
    C_pad = _round_up(C, 8)                      # sublane-align filter / output rows
    T_pad = _round_up(T, t_tile)
    num_t = T_pad // t_tile
    W = t_tile + K_pad                           # per-tile window length (mult. of 128)
    N_pad = T_pad + K_pad                        # padded input length (>= N + 1)

    # ---- parameter / input plumbing (plain JAX, outside the hot loop) ---------------
    # xp[b, 0, 1 + j] = x[b, j].  The single left-pad column keeps every roll amount
    # strictly inside (0, W); the right pad zero-fills the tail tile.
    xp = jnp.zeros((B, 1, N_pad), jnp.float32)
    xp = xp.at[:, 0, 1:1 + N].set(x.astype(jnp.float32))
    # Reversed filter placed in the *last* K columns: column r multiplies the patch
    # row that holds x[s + tau + (K_pad - 1 - r)].
    f_arr = jnp.zeros((C_pad, K_pad), compute_dtype)
    f_arr = f_arr.at[:C, K_pad - K:].set(filters[:, ::-1].astype(compute_dtype))

    def kernel(x_ref, f_ref, o_ref):
        t = pl.program_id(1)
        start = pl.multiple_of(t * t_tile, t_tile)       # multiple of 128
        w = x_ref[0, :, pl.ds(start, W)]                 # (1, W) f32, aligned window
        if patch_mode == "roll":
            # One strided XLU roll builds the whole Hankel matrix:
            #   row r <- w rolled by (t_tile + r)  =>  P[r, tau] = w[tau + K_pad - r]
            wb = jnp.broadcast_to(w, (K_pad, W))
            patches = pltpu.roll(wb, t_tile, 1, stride=1, stride_axis=0)[:, :t_tile]
        else:
            # Portable fallback: K static slices of the VMEM-resident window value.
            rows = [w[:, K_pad - r:K_pad - r + t_tile]
                    for r in range(K_pad - K, K_pad)]
            pad_rows = ([jnp.zeros((K_pad - K, t_tile), jnp.float32)]
                        if K_pad > K else [])
            patches = jnp.concatenate(pad_rows + rows, axis=0)
        patches = patches.astype(compute_dtype)          # (K_pad, t_tile)
        # MXU: (C_pad, K_pad) @ (K_pad, t_tile) -> (C_pad, t_tile), f32 accumulate.
        o_ref[0, :, :] = jnp.dot(f_ref[...], patches,
                                 preferred_element_type=jnp.float32)

    out_pad = pl.pallas_call(
        kernel,
        out_shape=jax.ShapeDtypeStruct((B, C_pad, T_pad), jnp.float32),
        grid=(B, num_t),
        in_specs=[
            # Full padded input row, resident across the time-tile axis (per batch b).
            pl.BlockSpec((1, 1, N_pad), lambda b, t: (b, 0, 0)),
            # Filters: constant index_map -> DMA'd once, stays VMEM-resident.
            pl.BlockSpec((C_pad, K_pad), lambda b, t: (0, 0)),
        ],
        # Lane-dense (multiple-of-128) output tiles -> unmasked stores.
        out_specs=pl.BlockSpec((1, C_pad, t_tile), lambda b, t: (b, 0, t)),
        compiler_params=pltpu.CompilerParams(
            dimension_semantics=("parallel", "parallel"),
            vmem_limit_bytes=32 * 1024 * 1024,
        ),
    )(xp, f_arr)
    return out_pad[:, :C, :T]


def sinc_conv_forward(waveforms, params, sample_rate, min_low_hz, min_band_hz,
                      compute_dtype=jnp.bfloat16, t_tile=None, patch_mode="roll"):
    """waveforms: (B, 1, N) like the PyTorch module; returns ((B, C, N-K+1), filters)."""
    low_hz_, band_hz_, window_, n_ = params
    filters = build_filters(low_hz_, band_hz_, window_, n_,
                            sample_rate, min_low_hz, min_band_hz)       # (C, K)
    out = sinc_conv1d(waveforms[:, 0, :], filters, compute_dtype=compute_dtype,
                      t_tile=t_tile, patch_mode=patch_mode)
    return out, filters


# --------------------------------------------------------------------------------------
if __name__ == "__main__":
    B, N = 2, 300
    C_OUT, K_SIZE, SR = 8, 9, 16000
    MIN_LOW, MIN_BAND = 50, 50
    T_TILE = 128     # small tile so the test exercises a multi-tile time grid + padding

    key = jax.random.PRNGKey(0)
    waveforms = jax.random.normal(key, (B, 1, N), dtype=jnp.float32)   # NCW, C_in = 1

    low_hz_, band_hz_, window_, n_, K = make_sinc_params(C_OUT, K_SIZE, SR, MIN_LOW, MIN_BAND)
    filters = build_filters(low_hz_, band_hz_, window_, n_, SR, MIN_LOW, MIN_BAND)
    T_OUT = N - K + 1
    x2d = waveforms[:, 0, :]

    # References: f32 and bf16-operand / f32-accumulate.
    ref32 = lax.conv_general_dilated(
        waveforms, filters[:, None, :], window_strides=(1,), padding="VALID",
        dimension_numbers=("NCH", "OIH", "NCH"))
    refbf = lax.conv_general_dilated(
        waveforms.astype(jnp.bfloat16), filters.astype(jnp.bfloat16)[:, None, :],
        window_strides=(1,), padding="VALID",
        dimension_numbers=("NCH", "OIH", "NCH"),
        preferred_element_type=jnp.float32)

    def run_and_check(patch_mode):
        out32 = jax.block_until_ready(
            sinc_conv1d(x2d, filters, compute_dtype=jnp.float32,
                        t_tile=T_TILE, patch_mode=patch_mode))
        assert out32.shape == (B, C_OUT, T_OUT), out32.shape
        np.testing.assert_allclose(np.asarray(out32), np.asarray(ref32),
                                   rtol=2e-5, atol=2e-5)
        outbf = jax.block_until_ready(
            sinc_conv1d(x2d, filters, compute_dtype=jnp.bfloat16,
                        t_tile=T_TILE, patch_mode=patch_mode))
        np.testing.assert_allclose(np.asarray(outbf), np.asarray(refbf),
                                   rtol=1e-2, atol=1e-2)
        return out32

    # Fast path: single strided XLU roll builds the patch matrix.  If a particular TPU
    # generation / Mosaic build rejects the strided roll (or its semantics differ), fall
    # back to the portable slice-based patch builder and re-validate against the same
    # references before declaring success.
    try:
        out = run_and_check("roll")
    except Exception:
        out = run_and_check("slices")

    out = jax.block_until_ready(out)
    print("KERNEL_OK")
</pallas_src>

<mosaic_0001>
module attributes {stable_mosaic.version = 11 : i64} {
  func.func @kernel(%arg0: i32, %arg1: i32, %arg2: memref<1x1x512xf32, #tpu.memory_space<vmem>>, %arg3: memref<8x128xf32, #tpu.memory_space<vmem>>, %arg4: memref<1x8x128xf32, #tpu.memory_space<vmem>>) attributes {dimension_semantics = [#tpu.dimension_semantics<parallel>, #tpu.dimension_semantics<parallel>], iteration_bounds = array<i64: 2, 3>, scalar_prefetch = 0 : i64, scratch_operands = 0 : i64, tpu.core_type = #tpu.core_type<tc>, window_params = [{transform_indices = @transform_0, window_bounds = array<i64: 1, 1, 512>}, {pipeline_mode = #tpu.pipeline_mode<synchronous>, transform_indices = @transform_1, window_bounds = array<i64: 8, 128>}, {transform_indices = @transform_2, window_bounds = array<i64: 1, 8, 128>}]} {
    %c128_i32 = arith.constant 128 : i32
    %0 = arith.muli %arg1, %c128_i32 : i32
    %1 = tpu.assume_multiple %0, 128 : i32
    %c0 = arith.constant 0 : index
    %c0_0 = arith.constant 0 : index
    %2 = arith.index_cast %1 : i32 to index
    %3 = vector.load %arg2[%c0, %c0_0, %2] : memref<1x1x512xf32, #tpu.memory_space<vmem>>, vector<1x1x256xf32>
    %4 = vector.shape_cast %3 : vector<1x1x256xf32> to vector<1x256xf32>
    %5 = vector.shape_cast %4 : vector<1x256xf32> to vector<1x256xf32>
    %6 = vector.broadcast %5 : vector<1x256xf32> to vector<128x256xf32>
    %c128_i32_1 = arith.constant 128 : i32
    %7 = tpu.dynamic_rotate %6 by %c128_i32_1 dim 1 {stride = 1 : si32, stride_dimension = 0 : si32} : vector<128x256xf32>, i32 -> vector<128x256xf32>
    %8 = vector.extract_strided_slice %7 {offsets = [0, 0], sizes = [128, 128], strides = [1, 1]} : vector<128x256xf32> to vector<128x128xf32>
    %c0_2 = arith.constant 0 : index
    %c0_3 = arith.constant 0 : index
    %9 = vector.load %arg3[%c0_2, %c0_3] : memref<8x128xf32, #tpu.memory_space<vmem>>, vector<8x128xf32>
    %cst = arith.constant dense<0.000000e+00> : vector<8x128xf32>
    %10 = tpu.matmul %9, %8, %cst {dimension_numbers = #tpu.dot_dimension_numbers<[1], [0], [0], [1], [0, 0, 1, 1], [], []>} : vector<8x128xf32>, vector<128x128xf32>, vector<8x128xf32> -> vector<8x128xf32>
    %c0_4 = arith.constant 0 : index
    %c0_5 = arith.constant 0 : index
    %c0_6 = arith.constant 0 : index
    %11 = vector.load %arg4[%c0_4, %c0_5, %c0_6] : memref<1x8x128xf32, #tpu.memory_space<vmem>>, vector<1x8x128xf32>
    %12 = vector.shape_cast %11 : vector<1x8x128xf32> to vector<8x128xf32>
    %13 = vector.shape_cast %10 : vector<8x128xf32> to vector<1x8x128xf32>
    tpu.vector_store %arg4[%c0_4, %c0_5, %c0_6], %13 {strides = array<i32>} : memref<1x8x128xf32, #tpu.memory_space<vmem>>, vector<1x8x128xf32>,
    return
  }
  func.func @transform_0(%arg0: i32, %arg1: i32) -> (i32, i32, i32) {
    %c0_i32 = arith.constant 0 : i32
    %c0_i32_0 = arith.constant 0 : i32
    %c0_i32_1 = arith.constant 0 : i32
    return %arg0, %c0_i32, %c0_i32_0 : i32, i32, i32
  }
  func.func @transform_1(%arg0: i32, %arg1: i32) -> (i32, i32) {
    %c0_i32 = arith.constant 0 : i32
    %c0_i32_0 = arith.constant 0 : i32
    %c0_i32_1 = arith.constant 0 : i32
    return %c0_i32, %c0_i32_0 : i32, i32
  }
  func.func @transform_2(%arg0: i32, %arg1: i32) -> (i32, i32, i32) {
    %c0_i32 = arith.constant 0 : i32
    %c0_i32_0 = arith.constant 0 : i32
    return %arg0, %c0_i32, %arg1 : i32, i32, i32
  }
}

module attributes {stable_mosaic.version = 11 : i64} {
  func.func @kernel(%arg0: i32, %arg1: i32, %arg2: memref<1x1x512xf32, #tpu.memory_space<vmem>>, %arg3: memref<8x128xf32, #tpu.memory_space<vmem>>, %arg4: memref<1x8x128xf32, #tpu.memory_space<vmem>>) attributes {dimension_semantics = [#tpu.dimension_semantics<parallel>, #tpu.dimension_semantics<parallel>], iteration_bounds = array<i64: 2, 3>, scalar_prefetch = 0 : i64, scratch_operands = 0 : i64, tpu.core_type = #tpu.core_type<tc>, window_params = [{transform_indices = @transform_0, window_bounds = array<i64: 1, 1, 512>}, {pipeline_mode = #tpu.pipeline_mode<synchronous>, transform_indices = @transform_1, window_bounds = array<i64: 8, 128>}, {transform_indices = @transform_2, window_bounds = array<i64: 1, 8, 128>}]} {
    %c128_i32 = arith.constant 128 : i32
    %0 = arith.muli %arg1, %c128_i32 : i32
    %1 = tpu.assume_multiple %0, 128 : i32
    %c0 = arith.constant 0 : index
    %c0_0 = arith.constant 0 : index
    %2 = arith.index_cast %1 : i32 to index
    %3 = vector.load %arg2[%c0, %c0_0, %2] : memref<1x1x512xf32, #tpu.memory_space<vmem>>, vector<1x1x256xf32>
    %4 = vector.shape_cast %3 : vector<1x1x256xf32> to vector<1x256xf32>
    %5 = vector.extract_strided_slice %4 {offsets = [0, 9], sizes = [1, 128], strides = [1, 1]} : vector<1x256xf32> to vector<1x128xf32>
    %6 = vector.extract_strided_slice %4 {offsets = [0, 8], sizes = [1, 128], strides = [1, 1]} : vector<1x256xf32> to vector<1x128xf32>
    %7 = vector.extract_strided_slice %4 {offsets = [0, 7], sizes = [1, 128], strides = [1, 1]} : vector<1x256xf32> to vector<1x128xf32>
    %8 = vector.extract_strided_slice %4 {offsets = [0, 6], sizes = [1, 128], strides = [1, 1]} : vector<1x256xf32> to vector<1x128xf32>
    %9 = vector.extract_strided_slice %4 {offsets = [0, 5], sizes = [1, 128], strides = [1, 1]} : vector<1x256xf32> to vector<1x128xf32>
    %10 = vector.extract_strided_slice %4 {offsets = [0, 4], sizes = [1, 128], strides = [1, 1]} : vector<1x256xf32> to vector<1x128xf32>
    %11 = vector.extract_strided_slice %4 {offsets = [0, 3], sizes = [1, 128], strides = [1, 1]} : vector<1x256xf32> to vector<1x128xf32>
    %12 = vector.extract_strided_slice %4 {offsets = [0, 2], sizes = [1, 128], strides = [1, 1]} : vector<1x256xf32> to vector<1x128xf32>
    %13 = vector.extract_strided_slice %4 {offsets = [0, 1], sizes = [1, 128], strides = [1, 1]} : vector<1x256xf32> to vector<1x128xf32>
    %cst = arith.constant 0.000000e+00 : f32
    %14 = vector.broadcast %cst : f32 to vector<119x128xf32>
    %15 = tpu.concatenate %14, %5, %6, %7, %8, %9, %10, %11, %12, %13 in 0 : vector<119x128xf32>, vector<1x128xf32>, vector<1x128xf32>, vector<1x128xf32>, vector<1x128xf32>, vector<1x128xf32>, vector<1x128xf32>, vector<1x128xf32>, vector<1x128xf32>, vector<1x128xf32> -> vector<128x128xf32>
    %c0_1 = arith.constant 0 : index
    %c0_2 = arith.constant 0 : index
    %16 = vector.load %arg3[%c0_1, %c0_2] : memref<8x128xf32, #tpu.memory_space<vmem>>, vector<8x128xf32>
    %cst_3 = arith.constant dense<0.000000e+00> : vector<8x128xf32>
    %17 = tpu.matmul %16, %15, %cst_3 {dimension_numbers = #tpu.dot_dimension_numbers<[1], [0], [0], [1], [0, 0, 1, 1], [], []>} : vector<8x128xf32>, vector<128x128xf32>, vector<8x128xf32> -> vector<8x128xf32>
    %c0_4 = arith.constant 0 : index
    %c0_5 = arith.constant 0 : index
    %c0_6 = arith.constant 0 : index
    %18 = vector.load %arg4[%c0_4, %c0_5, %c0_6] : memref<1x8x128xf32, #tpu.memory_space<vmem>>, vector<1x8x128xf32>
    %19 = vector.shape_cast %18 : vector<1x8x128xf32> to vector<8x128xf32>
    %20 = vector.shape_cast %17 : vector<8x128xf32> to vector<1x8x128xf32>
    tpu.vector_store %arg4[%c0_4, %c0_5, %c0_6], %20 {strides = array<i32>} : memref<1x8x128xf32, #tpu.memory_space<vmem>>, vector<1x8x128xf32>,
    return
  }
  func.func @transform_0(%arg0: i32, %arg1: i32) -> (i32, i32, i32) {
    %c0_i32 = arith.constant 0 : i32
    %c0_i32_0 = arith.constant 0 : i32
    %c0_i32_1 = arith.constant 0 : i32
    return %arg0, %c0_i32, %c0_i32_0 : i32, i32, i32
  }
  func.func @transform_1(%arg0: i32, %arg1: i32) -> (i32, i32) {
    %c0_i32 = arith.constant 0 : i32
    %c0_i32_0 = arith.constant 0 : i32
    %c0_i32_1 = arith.constant 0 : i32
    return %c0_i32, %c0_i32_0 : i32, i32
  }
  func.func @transform_2(%arg0: i32, %arg1: i32) -> (i32, i32, i32) {
    %c0_i32 = arith.constant 0 : i32
    %c0_i32_0 = arith.constant 0 : i32
    return %arg0, %c0_i32, %arg1 : i32, i32, i32
  }
}

</mosaic_0001>

<bundles_post_ra>
// kernel: tpu_custom_call.1
= control target key start
LH: loop header
LB: loop body
LE: loop exit
PB: predicated region body
PF: predicated region fallthrough
CT: control target
= control target key end

     0   :  { %s1490_s0 = inlined_call_operand.hbm [shape: f32[2,1,512], index: 0, kind: input, shape index: {}]   ;;  %s1491_s1 = inlined_call_operand.hbm [shape: f32[8,128], index: 1, kind: input, shape index: {}]   ;;  %s1492_s2 = inlined_call_operand.hbm [shape: f32[2,8,384], index: 2, kind: output, shape index: {}]  }
   0x1   :  { %1502 = sst [smem:[#allocation15_spill]] %s1491_s1 }
   0x2   :  { %7 = vsyncpa [#allocation3], 0 }
   0x3   :  { %9 = vsyncpa [#allocation3 + $0x1], 0 }
   0x4   :  { %10 = vsyncpa [#allocation6], 0 }
   0x5   :  { %11 = vsyncpa [#allocation4], 0 }
   0x6   :  { %13 = vsyncpa [#allocation4 + $0x1], 0  ;;  %s1092_s9 = smov 0   ;;  %s1094_s10 = smov 0  }
   0x7   :  { %s1096_s11 = smov 0   ;;  %s1098_s12 = smov 0  }
   0x8   :  { %s1100_s13 = smov 0   ;;  %s1102_s14 = smov 0  }
   0x9   :  { %s1104_s15 = smov 0   ;;  %s1106_s16 = smov 0  }
   0xa   :  { %s1108_s17 = smov 0   ;;  %s1110_s18 = smov 0  }
   0xb   :  { %s1112_s19 = smov 0  }
   0xc LB: > { %1503 = sst [smem:[#allocation11_spill]] %s1045_s17  ;;  %s562_s20 = sadd.s32 4294967295, %s1053_s19   ;;  %s1053_s19 = sphi %s1112_s19, %s19_s19   ;;  %s1049_s18 = sphi %s1110_s18, %s1533_s18   ;;  %s1045_s17 = sphi %s1108_s17, %s1524_s17   ;;  %s1041_s16 = sphi %s1106_s16, %s1532_s16   ;;  %s1037_s15 = sphi %s1104_s15, %s1523_s15   ;;  %s1033_s14 = sphi %s1102_s14, %s1531_s14   ;;  %s1029_s13 = sphi %s1100_s13, %s1530_s13   ;;  %s1025_s12 = sphi %s1098_s12, %s1529_s12   ;;  %s1021_s11 = sphi %s1096_s11, %s1528_s11   ;;  %s1017_s10 = sphi %s1094_s10, %s1527_s10   ;;  %s1013_s9 = sphi %s1092_s9, %s1526_s9  }
   0xd   : > { %s563_s21 = sadd.s32 4294967294, %s1053_s19   ;;  %p51_p0 = scmp.ne.s32.totalorder %s1029_s13, %s1025_s12 }
   0xe   : > { %p1148_p1 = scmp.eq.s32.totalorder %s562_s20, 0  ;;  %s87_s23 = sadd.s32 1, %s1021_s11 }
   0xf   : > { %p97_p2 = scmp.ne.s32.totalorder %s1021_s11, %s1017_s10  ;;  %p98_p4 = scmp.eq.s32.totalorder %s562_s20, 5 }
  0x10   : > { %s1504_s22 = scalar_select %p1148_p1, 1, 0 }
  0x11   : > { %p1157_p3 = por %p1148_p1, %p51_p0  ;;  %p103_p5 = scmp.ne.s32.totalorder %s1017_s10, %s1013_s9 }
  0x12   : > { %p104_p6 = scmp.eq.s32.totalorder %s563_s21, 5  ;;  %p1163_p7 = por %p98_p4, %p97_p2 }
  0x13   : > { %s1505_s24 = scalar_select %p1157_p3, 1, 0 }
  0x14   : > { %s1506_s25 = scalar_select %p1163_p7, 1, 0 }
  0x15   : > { %p564_p8 = scmp.ge.s32.totalorder %s1053_s19, 1  ;;  %p1168_p9 = por %p104_p6, %p103_p5 }
  0x16   : > { %p111_p10 = scmp.lt.s32.totalorder %s1053_s19, 7  ;;  %s1055_s28 = smov [#allocation5]  }
  0x17   : > { %s1507_s26 = scalar_select %p1168_p9, 1, 0 }
  0x18   : > { %p1173_p11 = pnand %p564_p8, %p111_p10  ;;  %s124_s29 = sshll.u32 %s1055_s28, 4  ;;  %s125_s29 = int_to_ptr.vmem [resolvable:$true] %s124_s29 }
  0x19   : > { %1508 = sst [smem:[#allocation12_spill]] %s1507_s26  ;;  %s28_s3 = sadd.s32 1, %s1045_s17 }
  0x1a   : > { %s1509_s27 = scalar_select %p1173_p11, 1, 0 }
  0x1b   : > { %p665_p12 = pneg %p1173_p11  ;;  %s1511_s1 = sld [smem:[#allocation15_spill]] }
  0x1d   : > { %p1181_p13 = pnand %p665_p12, %p1148_p1 }
  0x1f   : > { %p871_p2 = pneg %p1181_p13 }
  0x21   : > { %s869_s6 = scalar_lea.hbm %s1511_s1, 128 }
  0x22   : > { %p870_p0 = scmp.ne.s32.totalorder %s1511_s1, %s869_s6  ;;  %p876_p6 = scmp.lt.u32.totalorder %s869_s6, %s1511_s1 }
  0x24   : > { %p872_p4 = pnand %p871_p2, %p870_p0 }
  0x26   : > { %p873_p5 = pneg %p872_p4 }
  0x28   : > { %p878_p8 = pnand %p876_p6, %p873_p5 }
  0x2a   : > { %881 = shalt.err (!%p878_p8)
}
  0x2b   : > { %s882_s21 = scalar_lea.vmem %s125_s29, 128  ;;  %p890_p7 = scmp.lt.s32.totalorder %s125_s29, %s125_s29 }
  0x2c   : > { %p883_p10 = scmp.ne.s32.totalorder %s125_s29, %s882_s21  ;;  %p891_p1 = scmp.lt.s32.totalorder %s882_s21, %s882_s21 }
  0x2e   : > { %p885_p12 = pnand %p883_p10, %p871_p2  ;;  %p892_p3 = por %p891_p1, %p890_p7 }
  0x30   : > { %p886_p9 = pneg %p885_p12 }
  0x32   : > { %p893_p11 = pnand %p892_p3, %p886_p9 }
  0x34   : > { %896 = shalt.err (!%p893_p11)
}
  0x35   : > { %668 = dma.hbm_to_vmem [thread:$0]  (!%p1181_p13), %s1511_s1, 128, %s125_s29, [#allocation6]  }
  0x36   : > { %p29_p0 = scmp.ge.s32.totalorder %s28_s3, 3  ;;  %s31_s5 = sadd.s32 1, %s1049_s18 }
  0x37   : > { %s38_s6 = sadd.s32 1, %s1033_s14  ;;  %p45_p1 = scmp.ne.s32.totalorder %s1033_s14, %s1029_s13 }
  0x38   : > { %s1535_s3 = smov (%p29_p0, %s28_s3), 0  ;;  %s1537_s5 = smov (!%p29_p0, %s31_s5), %s1049_s18 }
  0x39   : > { %1512 = sst [smem:[#allocation13_spill]] %s1535_s3  ;;  %p46_p3 = scmp.eq.s32.totalorder %s1053_s19, 0 }
  0x3a   : > { %s83_s30 = ssub.s32 %s1045_s17, %s1535_s3  ;;  %p33_p7 = scmp.ge.s32.totalorder %s1537_s5, 2 }
  0x3b   : > { %p678_p9 = scmp.lt.s32.totalorder %s1053_s19, 6  ;;  %p1213_p11 = por %p46_p3, %p45_p1 }
  0x3c   : > { %s135_s29 = sand.u32 1, %s1033_s14   ;;  %s1539_s5 = smov (%p33_p7, %s1537_s5), 0 }
  0x3d   : > { %1514 = sst [smem:[#allocation14_spill]] %s1539_s5  ;;  %s567_s8 = sshll.u32 %s135_s29, 2 }
  0x3e   : > { %s35_s12 = ssub.s32 %s1049_s18, %s1539_s5  ;;  %s579_s21 = sshll.u32 %s1049_s18, 6 }
  0x3f   : > { %p36_p13 = scmp.eq.s32.totalorder %s35_s12, 0  ;;  %s84_s20 = sor.u32 %s83_s30, %s35_s12 }
  0x40   : > { %p85_p2 = scmp.eq.s32.totalorder %s84_s20, 0  ;;  %s1234_s17 = scalar_lea.hbm %s1490_s0, %s579_s21 }
  0x41   : > { %s1224_s28 = scalar_select %p36_p13, %s1033_s14, %s38_s6  }
  0x42   : > { %s1229_s4 = scalar_select %p85_p2, %s1021_s11, %s87_s23  }
  0x43   : > { %s139_s26 = scalar_lea.vmem [#allocation2], %s567_s8  ;;  %p1242_p4 = pnand %p678_p9, %p1213_p11 }
  0x44   : > { %s147_s5 = sshll.u32 %s139_s26, 4  ;;  %s136_s23 = scalar_lea.sflag [#allocation3], %s135_s29  ;;  %s1236_s5 = int_to_ptr.vmem [resolvable:$true] %s147_s5 }
  0x45   : > { %s897_s1 = scalar_lea.hbm %s1234_s17, 64  ;;  %p899_p6 = pneg %p1242_p4 }
  0x46   : > { %p898_p5 = scmp.ne.s32.totalorder %s1234_s17, %s897_s1  ;;  %s902_s30 = scalar_lea.hbm %s1490_s0, 128 }
  0x47   : > { %p903_p12 = scmp.lt.u32.totalorder %s1234_s17, %s1490_s0  ;;  %p904_p0 = scmp.lt.u32.totalorder %s902_s30, %s897_s1 }
  0x48   : > { %p900_p8 = pnand %p899_p6, %p898_p5  ;;  %p906_p3 = scmp.lt.u32.totalorder %s897_s1, %s1234_s17 }
  0x49   : > { %p905_p1 = por %p904_p0, %p903_p12 }
  0x4a   : > { %p901_p10 = pneg %p900_p8 }
  0x4b   : > { %p907_p7 = por %p906_p3, %p905_p1 }
  0x4d   : > { %p908_p9 = pnand %p907_p7, %p901_p10 }
  0x4f   : > { %911 = shalt.err (!%p908_p9)
}
  0x50   : > { %s912_s29 = scalar_lea.vmem %s1236_s5, 64  ;;  %s1056_s12 = smov [#allocation2]  }
  0x51   : > { %p913_p11 = scmp.ne.s32.totalorder %s1236_s5, %s912_s29  ;;  %s917_s20 = sshll.u32 %s1056_s12, 4  ;;  %s918_s20 = int_to_ptr.vmem [resolvable:$false] %s917_s20 }
  0x52   : > { %s919_s21 = scalar_lea.vmem %s918_s20, 128  ;;  %p920_p5 = scmp.lt.s32.totalorder %s1236_s5, %s918_s20 }
  0x53   : > { %p915_p13 = pnand %p913_p11, %p899_p6  ;;  %p921_p8 = scmp.lt.s32.totalorder %s919_s21, %s912_s29 }
  0x55   : > { %p916_p2 = pneg %p915_p13  ;;  %p922_p12 = por %p921_p8, %p920_p5 }
  0x57   : > { %p923_p0 = pnand %p922_p12, %p916_p2 }
  0x59   : > { %926 = shalt.err (!%p923_p0)
}
  0x5a   : > { %672 = dma.hbm_to_vmem [thread:$0]  (!%p1242_p4), %s1234_s17, 64, %s1236_s5, %s136_s23  }
  0x5b   : > { %p1516_p10 = scmp.ne.s32.totalorder %s1509_s27, 0 }
  0x5c   : > { %s158_s1 = sand.u32 (!%p1516_p10), 1, %s1029_s13   ;;  %p1517_p6 = scmp.ne.s32.totalorder (!%p1516_p10), %s1505_s24, 0 }
  0x5d   : > { %156 = sbr.rel (%p1516_p10) target bundleno = 495 (0x1ef), region = 28  ;;  %s571_s26 = sshll.u32 (!%p1516_p10), %s158_s1, 2 }
  0x5e   : > { %s159_s3 = scalar_lea.sflag (!%p1516_p10), [#allocation3], %s158_s1  ;;  %s162_s30 = scalar_lea.vmem (!%p1516_p10), [#allocation2], %s571_s26 }
  0x64   : > { %1000 = dma.done.wait (%p1517_p6), %s159_s3, 64  }
  0x65   : > { %1002 = vsyncadd (%p1517_p6), %s159_s3, 4294967232  ;;  %p1518_p1 = scmp.ne.s32.totalorder %s1504_s22, 0 }
  0x67   : > { %1004 = dma.done.wait (%p1518_p1), [#allocation6], 128  }
  0x68   : > { %1006 = vsyncadd (%p1518_p1), [#allocation6], 4294967168  ;;  %s574_s17 = sshll.u32 %s1037_s15, 7  ;;  %v193_v0 = vlaneseq  ;;  %v1057_v5 = vmov 0.0|0.0   ;;  %s1058_s22 = smov 272   ;;  %vm1072_vm13 = vmmov 0  }
  0x69   : > { %s188_s27 = sshra.s32 %s574_s17, 7  ;;  %632 = vmatprep.subr.bf16.mxu0 %v1057_v5  ;;  %s1059_s24 = smov 256   ;;  %v1073_v25 = vmov 0.0  }
  0x6a   : > { %v1283_v1 = vshrl.u32 %v193_v0, 7  ;;  %v1285_v2 = vand.u32 127, %v193_v0  ;;  %s190_s5 = scalar_lea.vmem %s162_s30, %s188_s27 [#allocation2]  ;;  %s1060_s6 = smov 280   ;;  %629 = vmatprep.mubr.msk.f32.mxu0 %vm1072_vm13, %v1073_v25 }
  0x6b   : > { %v191_v9 = vld [vmem:[%s190_s5] sm:$0x3]  ;;  %s1061_s23 = smov 264   ;;  %s1062_s7 = smov 296  }
  0x6c   : > { %v195_v3 = vsub.s32 0, %v1283_v1  ;;  %v199_v4 = vsub.s32 1, %v1283_v1  ;;  %vm213_vm0 = vcmp.lt.s32.totalorder %v1285_v2, %v1283_v1  ;;  %v1293_v6 = vadd.s32 8, %v1283_v1  ;;  %s1063_s8 = smov 288   ;;  %s1064_s29 = smov 312  }
  0x6d   : > { %v1296_v7 = vadd.s32 16, %v1283_v1  ;;  %v1299_v8 = vadd.s32 24, %v1283_v1  ;;  %v1308_v13 = vadd.s32 32, %v1283_v1  ;;  %v1313_v14 = vadd.s32 40, %v1283_v1  ;;  %s1065_s12 = smov 304   ;;  %s1066_s20 = smov 328  }
  0x6e   : > { %vm224_vm1 = vcmp.lt.s32.totalorder %v1285_v2, %v1293_v6  ;;  %v196_v10 = vrot.slane %v191_v9, %v195_v3  ;;  %v200_v11 = vrot.slane %v191_v9, %v199_v4  ;;  %v1316_v15 = vadd.s32 48, %v1283_v1  ;;  %s1067_s21 = smov 320   ;;  %s1068_s1 = smov 344  }
  0x6f   : > { %vm235_vm2 = vcmp.lt.s32.totalorder %v1285_v2, %v1296_v7  ;;  %vm246_vm3 = vcmp.lt.s32.totalorder %v1285_v2, %v1299_v8  ;;  %vm257_vm4 = vcmp.lt.s32.totalorder %v1285_v2, %v1308_v13  ;;  %v1319_v16 = vadd.s32 56, %v1283_v1  ;;  %s1069_s26 = smov 336   ;;  %s1070_s3 = smov 360  }
  0x70   : > { %v799_v12 = vpack.i.bf16 %v200_v11, %v196_v10  ;;  %vm268_vm5 = vcmp.lt.s32.totalorder %v1285_v2, %v1313_v14  ;;  %vm279_vm6 = vcmp.lt.s32.totalorder %v1285_v2, %v1316_v15  ;;  %v1328_v17 = vadd.s32 64, %v1283_v1  ;;  %s1071_s30 = smov 352   ;;  %s1074_s17 = smov 376  }
  0x71   : > { %vm290_vm7 = vcmp.lt.s32.totalorder %v1285_v2, %v1319_v16  ;;  %v1331_v18 = vadd.s32 72, %v1283_v1  ;;  %v1338_v19 = vadd.s32 80, %v1283_v1  ;;  %v1341_v20 = vadd.s32 88, %v1283_v1  ;;  %s1075_s27 = smov 368   ;;  %s184_s5 = sand.u32 1, %s1017_s10  }
  0x72   : > { %800 = vrot.lane.b32.xlu1 %v799_v12, %s1058_s22  ;;  %790 = vrot.lane.b32.xlu0 %v799_v12, %s1059_s24  ;;  %vm301_vm8 = vcmp.lt.s32.totalorder %v1285_v2, %v1328_v17  ;;  %v1348_v21 = vadd.s32 96, %v1283_v1  ;;  %v1351_v22 = vadd.s32 104, %v1283_v1  ;;  %v1358_v23 = vadd.s32 112, %v1283_v1  ;;  %s573_s22 = sshll.u32 %s184_s5, 3  ;;  %s656_s24 = smul.u32 3, %s1041_s16 }
  0x73   : > { %vm312_vm9 = vcmp.lt.s32.totalorder %v1285_v2, %v1331_v18  ;;  %vm323_vm10 = vcmp.lt.s32.totalorder %v1285_v2, %v1338_v19  ;;  %vm334_vm11 = vcmp.lt.s32.totalorder %v1285_v2, %v1341_v20  ;;  %v1361_v24 = vadd.s32 120, %v1283_v1  ;;  %p1520_p3 = scmp.ne.s32.totalorder %s1506_s25, 0 }
  0x74   : > { %vm345_vm12 = vcmp.lt.s32.totalorder %v1285_v2, %v1348_v21  ;;  %vm367_vm14 = vcmp.lt.s32.totalorder %v1285_v2, %v1358_v23 }
  0x75   : > { %vm378_vm15 = vcmp.lt.s32.totalorder %v1285_v2, %v1361_v24 }
  0x76   : > { %805 = vrot.lane.b32.xlu1 %v799_v12, %s1060_s6  ;;  %795 = vrot.lane.b32.xlu0 %v799_v12, %s1061_s23  ;;  %s464_s6 = sadd.s32 %s1037_s15, %s656_s24  ;;  %s186_s23 = scalar_lea.vmem [#allocation7], %s573_s22 }
  0x77   : > { %s1076_s15 = smov [#allocation7]  }
  0x78   : > { %s931_s16 = sshll.u32 %s1076_s15, 4  ;;  %s932_s16 = int_to_ptr.vmem [resolvable:$false] %s931_s16 }
  0x7a   : > { %815 = vrot.lane.b32.xlu1 %v799_v12, %s1062_s7  ;;  %810 = vrot.lane.b32.xlu0 %v799_v12, %s1063_s8  ;;  %s468_s7 = sshll.u32 %s186_s23, 4  ;;  %s576_s8 = sshll.u32 %s464_s6, 7  ;;  %s1425_s7 = int_to_ptr.vmem [resolvable:$true] %s468_s7 }
  0x7b   : > { %p934_p11 = scmp.lt.s32.totalorder %s1425_s7, %s932_s16 }
  0x7e   : > { %825 = vrot.lane.b32.xlu1 %v799_v12, %s1064_s29  ;;  %820 = vrot.lane.b32.xlu0 %v799_v12, %s1065_s12 }
  0x82   : > { %835 = vrot.lane.b32.xlu1 %v799_v12, %s1066_s20  ;;  %830 = vrot.lane.b32.xlu0 %v799_v12, %s1067_s21  ;;  %s1430_s20 = scalar_lea.hbm %s1492_s2, %s576_s8  ;;  %s453_s21 = scalar_lea.sflag [#allocation4], %s184_s5 }
  0x86   : > { %845 = vrot.lane.b32.xlu1 %v799_v12, %s1068_s1  ;;  %840 = vrot.lane.b32.xlu0 %v799_v12, %s1069_s26  ;;  %s927_s1 = scalar_lea.vmem %s1425_s7, 128  ;;  %s933_s26 = scalar_lea.vmem %s932_s16, 256 }
  0x87   : > { %p928_p4 = scmp.ne.s32.totalorder %s1425_s7, %s927_s1  ;;  %p935_p13 = scmp.lt.s32.totalorder %s933_s26, %s927_s1 }
  0x89   : > { %p929_p7 = pnand %p928_p4, %p1520_p3  ;;  %p936_p2 = por %p935_p13, %p934_p11 }
  0x8a   : > { %855 = vrot.lane.b32.xlu1 %v799_v12, %s1070_s3  ;;  %850 = vrot.lane.b32.xlu0 %v799_v12, %s1071_s30 }
  0x8b   : > { %p930_p9 = pneg %p929_p7 }
  0x8d   : > { %p937_p5 = pnand %p936_p2, %p930_p9 }
  0x8e   : > { %865 = vrot.lane.b32.xlu1 %v799_v12, %s1074_s17  ;;  %860 = vrot.lane.b32.xlu0 %v799_v12, %s1075_s27 }
  0xe4   : > { %v801_v26 = vpop.permute.xlu1 %800  ;;  %v791_v27 = vpop.permute.xlu0 %790 }
  0xe5   : > { %v803_v28 = vunpack.i.h.bf16 %v801_v26  ;;  %v802_v29 = vunpack.i.l.bf16 %v801_v26  ;;  %v793_v30 = vunpack.i.h.bf16 %v791_v27  ;;  %v792_v31 = vunpack.i.l.bf16 %v791_v27 }
  0xe7   : > { %v236_v34 = vsel %vm235_vm2, %v802_v29, %v803_v28  ;;  %v214_v39 = vsel %vm213_vm0, %v792_v31, %v793_v30  ;;  %vm1519_vm0 = vcmp.lt.s32.totalorder %v1285_v2, %v1351_v22 }
  0xe8   : > { %v806_v32 = vpop.permute.xlu1 %805  ;;  %v796_v33 = vpop.permute.xlu0 %795 }
  0xe9   : > { %v808_v35 = vunpack.i.h.bf16 %v806_v32  ;;  %v807_v36 = vunpack.i.l.bf16 %v806_v32  ;;  %v798_v37 = vunpack.i.h.bf16 %v796_v33  ;;  %v797_v38 = vunpack.i.l.bf16 %v796_v33 }
  0xeb   : > { %v225_v40 = vsel %vm224_vm1, %v797_v38, %v798_v37  ;;  %v247_v41 = vsel %vm246_vm3, %v807_v36, %v808_v35  ;;  %v380_v38 = vld [vmem:[#allocation5] sm:$0xff] }
  0xec   : > { %v633_v42 = vpack.c.bf16 %v225_v40, %v214_v39  ;;  %v816_v43 = vpop.permute.xlu1 %815  ;;  %v811_v44 = vpop.permute.xlu0 %810  ;;  %v636_v45 = vpack.c.bf16 %v247_v41, %v236_v34 }
  0xed   : > { %v818_v46 = vunpack.i.h.bf16 %v816_v43  ;;  %v817_v47 = vunpack.i.l.bf16 %v816_v43  ;;  %v813_v48 = vunpack.i.h.bf16 %v811_v44  ;;  %v812_v49 = vunpack.i.l.bf16 %v811_v44 }
  0xee   : > { %634 = vmatpush3.bf16.msra.mxu0 %v633_v42 }
  0xef   : > { %635 = vmatprep.subr.bf16.mxu0 %v1057_v5  ;;  %v258_v50 = vsel %vm257_vm4, %v812_v49, %v813_v48  ;;  %v269_v51 = vsel %vm268_vm5, %v817_v47, %v818_v46 }
  0xf0   : > { %v826_v52 = vpop.permute.xlu1 %825  ;;  %v821_v53 = vpop.permute.xlu0 %820  ;;  %v639_v54 = vpack.c.bf16 %v269_v51, %v258_v50 }
  0xf1   : > { %v828_v55 = vunpack.i.h.bf16 %v826_v52  ;;  %v827_v56 = vunpack.i.l.bf16 %v826_v52  ;;  %v823_v57 = vunpack.i.h.bf16 %v821_v53  ;;  %v822_v58 = vunpack.i.l.bf16 %v821_v53 }
  0xf2   : > { %637 = vmatpush3.bf16.msra.mxu0 %v636_v45 }
  0xf3   : > { %638 = vmatprep.subr.bf16.mxu0 %v1057_v5  ;;  %v280_v59 = vsel %vm279_vm6, %v822_v58, %v823_v57  ;;  %v291_v60 = vsel %vm290_vm7, %v827_v56, %v828_v55 }
  0xf4   : > { %v836_v61 = vpop.permute.xlu1 %835  ;;  %v831_v62 = vpop.permute.xlu0 %830  ;;  %v642_v63 = vpack.c.bf16 %v291_v60, %v280_v59 }
  0xf5   : > { %v838_v0 = vunpack.i.h.bf16 %v836_v61  ;;  %v837_v1 = vunpack.i.l.bf16 %v836_v61  ;;  %v833_v3 = vunpack.i.h.bf16 %v831_v62  ;;  %v832_v4 = vunpack.i.l.bf16 %v831_v62 }
  0xf6   : > { %640 = vmatpush3.bf16.msra.mxu0 %v639_v54 }
  0xf7   : > { %641 = vmatprep.subr.bf16.mxu0 %v1057_v5  ;;  %v302_v6 = vsel %vm301_vm8, %v832_v4, %v833_v3  ;;  %v313_v7 = vsel %vm312_vm9, %v837_v1, %v838_v0 }
  0xf8   : > { %v846_v8 = vpop.permute.xlu1 %845  ;;  %v841_v9 = vpop.permute.xlu0 %840  ;;  %v645_v10 = vpack.c.bf16 %v313_v7, %v302_v6 }
  0xf9   : > { %v848_v11 = vunpack.i.h.bf16 %v846_v8  ;;  %v847_v12 = vunpack.i.l.bf16 %v846_v8  ;;  %v843_v13 = vunpack.i.h.bf16 %v841_v9  ;;  %v842_v14 = vunpack.i.l.bf16 %v841_v9 }
  0xfa   : > { %643 = vmatpush3.bf16.msra.mxu0 %v642_v63 }
  0xfb   : > { %644 = vmatprep.subr.bf16.mxu0 %v1057_v5  ;;  %v324_v15 = vsel %vm323_vm10, %v842_v14, %v843_v13  ;;  %v335_v16 = vsel %vm334_vm11, %v847_v12, %v848_v11 }
  0xfc   : > { %v856_v17 = vpop.permute.xlu1 %855  ;;  %v851_v18 = vpop.permute.xlu0 %850  ;;  %v648_v25 = vpack.c.bf16 %v335_v16, %v324_v15 }
  0xfd   : > { %v858_v26 = vunpack.i.h.bf16 %v856_v17  ;;  %v857_v27 = vunpack.i.l.bf16 %v856_v17  ;;  %v853_v28 = vunpack.i.h.bf16 %v851_v18  ;;  %v852_v29 = vunpack.i.l.bf16 %v851_v18 }
  0xfe   : > { %646 = vmatpush3.bf16.msra.mxu0 %v645_v10 }
  0xff   : > { %647 = vmatprep.subr.bf16.mxu0 %v1057_v5  ;;  %v346_v30 = vsel %vm345_vm12, %v852_v29, %v853_v28  ;;  %v357_v19 = vsel %vm1519_vm0, %v857_v27, %v858_v26 }
 0x100   : > { %v866_v20 = vpop.permute.xlu1 %865  ;;  %v861_v31 = vpop.permute.xlu0 %860  ;;  %v651_v32 = vpack.c.bf16 %v357_v19, %v346_v30 }
 0x101   : > { %v868_v33 = vunpack.i.h.bf16 %v866_v20  ;;  %v867_v34 = vunpack.i.l.bf16 %v866_v20  ;;  %v863_v35 = vunpack.i.h.bf16 %v861_v31  ;;  %v862_v36 = vunpack.i.l.bf16 %v861_v31 }
 0x102   : > { %649 = vmatpush3.bf16.msra.mxu0 %v648_v25 }
 0x103   : > { %650 = vmatprep.subr.bf16.mxu0 %v1057_v5  ;;  %v368_v21 = vsel %vm367_vm14, %v862_v36, %v863_v35  ;;  %v379_v22 = vsel %vm378_vm15, %v867_v34, %v868_v33 }
 0x104   : > { %v654_v37 = vpack.c.bf16 %v379_v22, %v368_v21 }
 0x106   : > { %652 = vmatpush3.bf16.msra.mxu0 %v651_v32 }
 0x107   : > { %653 = vmatprep.subr.bf16.mxu0 %v1057_v5 }
 0x10a   : > { %655 = vmatpush3.bf16.msra.mxu0 %v654_v37 }
 0x10d   : > { %630 = vmatmul.mubr.f32.vlgmr.msra.gmra.mrb[0].mxu0 %v380_v38 }
 0x1e0   : > { %v447_v2 = vpop.f32.mrb[0].mxu0 }
 0x1e1   : > { %451 = vst [vmem:[%s186_s23] sm:$0xff] %v447_v2  ;;  %v631_v5 = vpop.f32.mrb[1].mxu0 }
 0x1e2   : > { %940 = shalt.err (!%p937_p5)
}
 0x1e3   : > { %s941_s3 = scalar_lea.hbm %s1430_s20, 128  ;;  %s945_s27 = scalar_lea.hbm %s1492_s2, 768 }
 0x1e4   : > { %p942_p8 = scmp.ne.s32.totalorder %s1430_s20, %s941_s3  ;;  %p946_p10 = scmp.lt.u32.totalorder %s1430_s20, %s1492_s2 }
 0x1e5   : > { %p947_p6 = scmp.lt.u32.totalorder %s945_s27, %s941_s3  ;;  %p949_p4 = scmp.lt.u32.totalorder %s941_s3, %s1430_s20 }
 0x1e6   : > { %p943_p12 = pnand %p942_p8, %p1520_p3 }
 0x1e7   : > { %p948_p1 = por %p947_p6, %p946_p10 }
 0x1e8   : > { %p944_p0 = pneg %p943_p12 }
 0x1e9   : > { %p950_p7 = por %p949_p4, %p948_p1 }
 0x1eb   : > { %p951_p9 = pnand %p950_p7, %p944_p0 }
 0x1ed   : > { %954 = shalt.err (!%p951_p9)
}
 0x1ee   : > { %663 = dma.vmem_to_hbm [thread:$0]  (%p1520_p3), %s1425_s7, 128, %s1430_s20, %s453_s21  }
 0x1ef PF: > { %s1521_s24 = sld [smem:[#allocation12_spill]]  ;;  %p680_p11 = scmp.ge.s32.totalorder %s1053_s19, 2 }
 0x1f0   : > { %s480_s6 = sand.u32 1, %s1013_s9  }
 0x1f1   : > { %s481_s23 = scalar_lea.sflag [#allocation4], %s480_s6 }
 0x1f5   : > { %p1522_p13 = scmp.ne.s32.totalorder %s1521_s24, 0 }
 0x1f7   : > { %p674_p2 = pnand %p680_p11, %p1522_p13 }
 0x1f9   : > { %1008 = dma.done.wait (!%p674_p2), %s481_s23, 128  }
 0x1fa   : > { %1010 = vsyncadd (!%p674_p2), %s481_s23, 4294967168  ;;  %s19_s19 = sadd.s32 1, %s1053_s19   ;;  %s1523_s15 = sld [smem:[#allocation11_spill]] }
 0x1fb   : > { %p16_p5 = scmp.ge.s32.totalorder %s19_s19, 8   ;;  %s1524_s17 = sld [smem:[#allocation13_spill]] }
 0x1fc   : > { %s1525_s25 = sld [smem:[#allocation14_spill]]  ;;  %s1526_s9 = smov %s1017_s10 }
 0x1fd   : > { %s1527_s10 = smov %s1021_s11  ;;  %s1528_s11 = smov %s1229_s4 }
 0x1fe   : > { %s1529_s12 = smov %s1029_s13  ;;  %s1530_s13 = smov %s1033_s14 }
 0x1ff   : > { %s1531_s14 = smov %s1224_s28  ;;  %s1532_s16 = smov %s1049_s18 }
 0x200   :  { %18 = sbr.rel (!%p16_p5) target bundleno = 12 (0xc), region = 78 }
 0x202   : > { %s1533_s18 = smov %s1525_s25 }
 0x207   :  { %486 = vsyncpa [#allocation3], 1 }
 0x208   :  { %488 = vsyncpa [#allocation3 + $0x1], 1 }
 0x209   :  { %489 = vsyncpa [#allocation6], 1 }
 0x20a   :  { %490 = vsyncpa [#allocation4], 1 }
 0x20b   :  { %492 = vsyncpa [#allocation4 + $0x1], 1 }

// kernel: tpu_custom_call.1
= control target key start
LH: loop header
LB: loop body
LE: loop exit
PB: predicated region body
PF: predicated region fallthrough
CT: control target
= control target key end

     0   :  { %s1201_s0 = inlined_call_operand.hbm [shape: f32[2,1,512], index: 0, kind: input, shape index: {}]   ;;  %s1202_s1 = inlined_call_operand.hbm [shape: f32[8,128], index: 1, kind: input, shape index: {}]   ;;  %s1203_s2 = inlined_call_operand.hbm [shape: f32[2,8,384], index: 2, kind: output, shape index: {}]  }
   0x1   :  { %1213 = sst [smem:[#allocation15_spill]] %s1202_s1 }
   0x2   :  { %7 = vsyncpa [#allocation3], 0 }
   0x3   :  { %9 = vsyncpa [#allocation3 + $0x1], 0 }
   0x4   :  { %10 = vsyncpa [#allocation6], 0 }
   0x5   :  { %11 = vsyncpa [#allocation4], 0 }
   0x6   :  { %13 = vsyncpa [#allocation4 + $0x1], 0  ;;  %s940_s9 = smov 0   ;;  %s942_s10 = smov 0  }
   0x7   :  { %s944_s11 = smov 0   ;;  %s946_s12 = smov 0  }
   0x8   :  { %s948_s13 = smov 0   ;;  %s950_s14 = smov 0  }
   0x9   :  { %s952_s15 = smov 0   ;;  %s954_s16 = smov 0  }
   0xa   :  { %s956_s17 = smov 0   ;;  %s958_s18 = smov 0  }
   0xb   :  { %s960_s19 = smov 0  }
   0xc LB: > { %1214 = sst [smem:[#allocation11_spill]] %s899_s17  ;;  %s461_s20 = sadd.s32 4294967295, %s907_s19   ;;  %s907_s19 = sphi %s960_s19, %s19_s19   ;;  %s903_s18 = sphi %s958_s18, %s1243_s18   ;;  %s899_s17 = sphi %s956_s17, %s1234_s17   ;;  %s895_s16 = sphi %s954_s16, %s1242_s16   ;;  %s891_s15 = sphi %s952_s15, %s1233_s15   ;;  %s887_s14 = sphi %s950_s14, %s1241_s14   ;;  %s883_s13 = sphi %s948_s13, %s1240_s13   ;;  %s879_s12 = sphi %s946_s12, %s1239_s12   ;;  %s875_s11 = sphi %s944_s11, %s1238_s11   ;;  %s871_s10 = sphi %s942_s10, %s1237_s10   ;;  %s867_s9 = sphi %s940_s9, %s1236_s9  }
   0xd   : > { %s462_s21 = sadd.s32 4294967294, %s907_s19   ;;  %p51_p0 = scmp.ne.s32.totalorder %s883_s13, %s879_s12 }
   0xe   : > { %p996_p1 = scmp.eq.s32.totalorder %s461_s20, 0  ;;  %s87_s23 = sadd.s32 1, %s875_s11 }
   0xf   : > { %p97_p2 = scmp.ne.s32.totalorder %s875_s11, %s871_s10  ;;  %p98_p4 = scmp.eq.s32.totalorder %s461_s20, 5 }
  0x10   : > { %s1215_s22 = scalar_select %p996_p1, 1, 0 }
  0x11   : > { %p1005_p3 = por %p996_p1, %p51_p0  ;;  %p103_p5 = scmp.ne.s32.totalorder %s871_s10, %s867_s9 }
  0x12   : > { %p104_p6 = scmp.eq.s32.totalorder %s462_s21, 5  ;;  %p1011_p7 = por %p98_p4, %p97_p2 }
  0x13   : > { %s1216_s24 = scalar_select %p1005_p3, 1, 0 }
  0x14   : > { %s1217_s25 = scalar_select %p1011_p7, 1, 0 }
  0x15   : > { %p463_p8 = scmp.ge.s32.totalorder %s907_s19, 1  ;;  %p1016_p9 = por %p104_p6, %p103_p5 }
  0x16   : > { %p111_p10 = scmp.lt.s32.totalorder %s907_s19, 7  ;;  %s909_s28 = smov [#allocation5]  }
  0x17   : > { %s1218_s26 = scalar_select %p1016_p9, 1, 0 }
  0x18   : > { %p1021_p11 = pnand %p463_p8, %p111_p10  ;;  %s124_s29 = sshll.u32 %s909_s28, 4  ;;  %s125_s29 = int_to_ptr.vmem [resolvable:$true] %s124_s29 }
  0x19   : > { %1219 = sst [smem:[#allocation12_spill]] %s1218_s26  ;;  %s28_s3 = sadd.s32 1, %s899_s17 }
  0x1a   : > { %s1220_s27 = scalar_select %p1021_p11, 1, 0 }
  0x1b   : > { %p560_p12 = pneg %p1021_p11  ;;  %s1222_s1 = sld [smem:[#allocation15_spill]] }
  0x1d   : > { %p1029_p13 = pnand %p560_p12, %p996_p1 }
  0x1f   : > { %p725_p2 = pneg %p1029_p13 }
  0x21   : > { %s723_s6 = scalar_lea.hbm %s1222_s1, 128 }
  0x22   : > { %p724_p0 = scmp.ne.s32.totalorder %s1222_s1, %s723_s6  ;;  %p730_p6 = scmp.lt.u32.totalorder %s723_s6, %s1222_s1 }
  0x24   : > { %p726_p4 = pnand %p725_p2, %p724_p0 }
  0x26   : > { %p727_p5 = pneg %p726_p4 }
  0x28   : > { %p732_p8 = pnand %p730_p6, %p727_p5 }
  0x2a   : > { %735 = shalt.err (!%p732_p8)
}
  0x2b   : > { %s736_s21 = scalar_lea.vmem %s125_s29, 128  ;;  %p744_p7 = scmp.lt.s32.totalorder %s125_s29, %s125_s29 }
  0x2c   : > { %p737_p10 = scmp.ne.s32.totalorder %s125_s29, %s736_s21  ;;  %p745_p1 = scmp.lt.s32.totalorder %s736_s21, %s736_s21 }
  0x2e   : > { %p739_p12 = pnand %p737_p10, %p725_p2  ;;  %p746_p3 = por %p745_p1, %p744_p7 }
  0x30   : > { %p740_p9 = pneg %p739_p12 }
  0x32   : > { %p747_p11 = pnand %p746_p3, %p740_p9 }
  0x34   : > { %750 = shalt.err (!%p747_p11)
}
  0x35   : > { %563 = dma.hbm_to_vmem [thread:$0]  (!%p1029_p13), %s1222_s1, 128, %s125_s29, [#allocation6]  }
  0x36   : > { %p29_p0 = scmp.ge.s32.totalorder %s28_s3, 3  ;;  %s31_s5 = sadd.s32 1, %s903_s18 }
  0x37   : > { %s38_s6 = sadd.s32 1, %s887_s14  ;;  %p45_p1 = scmp.ne.s32.totalorder %s887_s14, %s883_s13 }
  0x38   : > { %s1245_s3 = smov (%p29_p0, %s28_s3), 0  ;;  %s1247_s5 = smov (!%p29_p0, %s31_s5), %s903_s18 }
  0x39   : > { %1223 = sst [smem:[#allocation13_spill]] %s1245_s3  ;;  %p46_p3 = scmp.eq.s32.totalorder %s907_s19, 0 }
  0x3a   : > { %s83_s30 = ssub.s32 %s899_s17, %s1245_s3  ;;  %p33_p7 = scmp.ge.s32.totalorder %s1247_s5, 2 }
  0x3b   : > { %p573_p9 = scmp.lt.s32.totalorder %s907_s19, 6  ;;  %p1061_p11 = por %p46_p3, %p45_p1 }
  0x3c   : > { %s135_s29 = sand.u32 1, %s887_s14   ;;  %s1249_s5 = smov (%p33_p7, %s1247_s5), 0 }
  0x3d   : > { %1225 = sst [smem:[#allocation14_spill]] %s1249_s5  ;;  %s466_s8 = sshll.u32 %s135_s29, 2 }
  0x3e   : > { %s35_s12 = ssub.s32 %s903_s18, %s1249_s5  ;;  %s480_s21 = sshll.u32 %s903_s18, 6 }
  0x3f   : > { %p36_p13 = scmp.eq.s32.totalorder %s35_s12, 0  ;;  %s84_s20 = sor.u32 %s83_s30, %s35_s12 }
  0x40   : > { %p85_p2 = scmp.eq.s32.totalorder %s84_s20, 0  ;;  %s1082_s17 = scalar_lea.hbm %s1201_s0, %s480_s21 }
  0x41   : > { %s1072_s28 = scalar_select %p36_p13, %s887_s14, %s38_s6  }
  0x42   : > { %s1077_s4 = scalar_select %p85_p2, %s875_s11, %s87_s23  }
  0x43   : > { %s139_s26 = scalar_lea.vmem [#allocation2], %s466_s8  ;;  %p1090_p4 = pnand %p573_p9, %p1061_p11 }
  0x44   : > { %s147_s5 = sshll.u32 %s139_s26, 4  ;;  %s136_s23 = scalar_lea.sflag [#allocation3], %s135_s29  ;;  %s1084_s5 = int_to_ptr.vmem [resolvable:$true] %s147_s5 }
  0x45   : > { %s751_s1 = scalar_lea.hbm %s1082_s17, 64  ;;  %p753_p6 = pneg %p1090_p4 }
  0x46   : > { %p752_p5 = scmp.ne.s32.totalorder %s1082_s17, %s751_s1  ;;  %s756_s30 = scalar_lea.hbm %s1201_s0, 128 }
  0x47   : > { %p757_p12 = scmp.lt.u32.totalorder %s1082_s17, %s1201_s0  ;;  %p758_p0 = scmp.lt.u32.totalorder %s756_s30, %s751_s1 }
  0x48   : > { %p754_p8 = pnand %p753_p6, %p752_p5  ;;  %p760_p3 = scmp.lt.u32.totalorder %s751_s1, %s1082_s17 }
  0x49   : > { %p759_p1 = por %p758_p0, %p757_p12 }
  0x4a   : > { %p755_p10 = pneg %p754_p8 }
  0x4b   : > { %p761_p7 = por %p760_p3, %p759_p1 }
  0x4d   : > { %p762_p9 = pnand %p761_p7, %p755_p10 }
  0x4f   : > { %765 = shalt.err (!%p762_p9)
}
  0x50   : > { %s766_s29 = scalar_lea.vmem %s1084_s5, 64  ;;  %s910_s12 = smov [#allocation2]  }
  0x51   : > { %p767_p11 = scmp.ne.s32.totalorder %s1084_s5, %s766_s29  ;;  %s771_s20 = sshll.u32 %s910_s12, 4  ;;  %s772_s20 = int_to_ptr.vmem [resolvable:$false] %s771_s20 }
  0x52   : > { %s773_s21 = scalar_lea.vmem %s772_s20, 128  ;;  %p774_p5 = scmp.lt.s32.totalorder %s1084_s5, %s772_s20 }
  0x53   : > { %p769_p13 = pnand %p767_p11, %p753_p6  ;;  %p775_p8 = scmp.lt.s32.totalorder %s773_s21, %s766_s29 }
  0x55   : > { %p770_p2 = pneg %p769_p13  ;;  %p776_p12 = por %p775_p8, %p774_p5 }
  0x57   : > { %p777_p0 = pnand %p776_p12, %p770_p2 }
  0x59   : > { %780 = shalt.err (!%p777_p0)
}
  0x5a   : > { %567 = dma.hbm_to_vmem [thread:$0]  (!%p1090_p4), %s1082_s17, 64, %s1084_s5, %s136_s23  }
  0x5b   : > { %p1227_p10 = scmp.ne.s32.totalorder %s1220_s27, 0 }
  0x5c   : > { %s158_s1 = sand.u32 (!%p1227_p10), 1, %s883_s13   ;;  %p1228_p6 = scmp.ne.s32.totalorder (!%p1227_p10), %s1216_s24, 0 }
  0x5d   : > { %156 = sbr.rel (%p1227_p10) target bundleno = 479 (0x1df), region = 28  ;;  %s470_s26 = sshll.u32 (!%p1227_p10), %s158_s1, 2 }
  0x5e   : > { %s159_s3 = scalar_lea.sflag (!%p1227_p10), [#allocation3], %s158_s1  ;;  %s162_s30 = scalar_lea.vmem (!%p1227_p10), [#allocation2], %s470_s26 }
  0x64   : > { %854 = dma.done.wait (%p1228_p6), %s159_s3, 64  }
  0x65   : > { %856 = vsyncadd (%p1228_p6), %s159_s3, 4294967232  ;;  %p1229_p1 = scmp.ne.s32.totalorder %s1215_s22, 0 }
  0x67   : > { %858 = dma.done.wait (%p1229_p1), [#allocation6], 128  }
  0x68   : > { %860 = vsyncadd (%p1229_p1), [#allocation6], 4294967168  ;;  %s473_s17 = sshll.u32 %s891_s15, 7  ;;  %v193_v0 = vlaneseq  ;;  %v911_v1 = vmov 0.0|0.0   ;;  %s912_s22 = smov 120   ;;  %vm918_vm0 = vmmov 0  }
  0x69   : > { %s188_s27 = sshra.s32 %s473_s17, 7  ;;  %533 = vmatprep.subr.bf16.mxu0 %v911_v1  ;;  %s913_s24 = smov 122   ;;  %v919_v9 = vmov 0.0   ;;  %vm212_vm1 = vcmask 982016   ;;  %vm226_vm2 = vcmask 998400   ;;  %vm219_vm3 = vcmask 990208  }
  0x6a   : > { %v194_v2 = vshrl.u32 %v193_v0, 7  ;;  %534 = vmatpush3.bf16.msra.mxu0 %v911_v1  ;;  %s190_s5 = scalar_lea.vmem %s162_s30, %s188_s27 [#allocation2]  ;;  %s914_s6 = smov 121   ;;  %530 = vmatprep.mubr.msk.f32.mxu0 %vm918_vm0, %v919_v9  ;;  %vm266_vm4 = vcmask 1040384   ;;  %vm233_vm5 = vcmask 1006592   ;;  %vm268_vm6 = vcmask 1041408   ;;  %v279_v54 = vld [vmem:[#allocation5] sm:$0xff] }
  0x6b   : > { %535 = vmatprep.subr.bf16.mxu0 %v911_v1  ;;  %v191_v5 = vld [vmem:[%s190_s5] sm:$0x3]  ;;  %s915_s23 = smov 123   ;;  %s916_s7 = smov 124   ;;  %vm270_vm7 = vcmask 1042432   ;;  %vm240_vm8 = vcmask 1014784  }
  0x6c   : > { %v195_v3 = vsub.s32 0, %v194_v2  ;;  %v199_v4 = vsub.s32 1, %v194_v2  ;;  %s917_s8 = smov 125   ;;  %s920_s29 = smov 126   ;;  %vm272_vm9 = vcmask 1043456   ;;  %vm247_vm10 = vcmask 1022976  }
  0x6d   : > { %s921_s12 = smov 127   ;;  %s922_s20 = smov 119   ;;  %vm274_vm11 = vcmask 1044480   ;;  %vm254_vm12 = vcmask 1031168   ;;  %vm276_vm13 = vcmask 1045504   ;;  %vm261_vm14 = vcmask 1039360  }
  0x6e   : > { %536 = vmatpush3.bf16.msra.mxu0 %v911_v1  ;;  %v196_v6 = vrot.slane %v191_v5, %v195_v3  ;;  %v200_v7 = vrot.slane %v191_v5, %v199_v4  ;;  %vm264_vm15 = vcmask 1046528   ;;  %vm205_vm0 = vcmask 973824   ;;  %s184_s21 = sand.u32 1, %s871_s10   ;;  %s551_s26 = smul.u32 3, %s895_s16 }
  0x6f   : > { %537 = vmatprep.subr.bf16.mxu0 %v911_v1  ;;  %s472_s1 = sshll.u32 %s184_s21, 3  ;;  %p1230_p3 = scmp.ne.s32.totalorder %s1217_s25, 0 }
  0x70   : > { %v678_v8 = vpack.i.bf16 %v200_v7, %v196_v6  ;;  %s363_s3 = sadd.s32 %s891_s15, %s551_s26  ;;  %s186_s30 = scalar_lea.vmem [#allocation7], %s472_s1 }
  0x71   : > { %s367_s17 = sshll.u32 %s186_s30, 4  ;;  %s477_s27 = sshll.u32 %s363_s3, 7  ;;  %s1136_s17 = int_to_ptr.vmem [resolvable:$true] %s367_s17 }
  0x72   : > { %538 = vmatpush3.bf16.msra.mxu0 %v911_v1  ;;  %679 = vrot.lane.b32.xlu0 %v678_v8, %s912_s22  ;;  %s924_s15 = smov [#allocation7]  }
  0x73   : > { %539 = vmatprep.subr.bf16.mxu0 %v911_v1  ;;  %689 = vrot.lane.b32.xlu1 %v678_v8, %s913_s24  ;;  %s1141_s24 = scalar_lea.hbm %s1203_s2, %s477_s27  ;;  %s785_s16 = sshll.u32 %s924_s15, 4  ;;  %s786_s16 = int_to_ptr.vmem [resolvable:$false] %s785_s16 }
  0x74   : > { %p788_p11 = scmp.lt.s32.totalorder %s1136_s17, %s786_s16 }
  0x76   : > { %540 = vmatpush3.bf16.msra.mxu0 %v911_v1  ;;  %684 = vrot.lane.b32.xlu0 %v678_v8, %s914_s6  ;;  %s352_s6 = scalar_lea.sflag [#allocation4], %s184_s21 }
  0x77   : > { %541 = vmatprep.subr.bf16.mxu0 %v911_v1  ;;  %694 = vrot.lane.b32.xlu1 %v678_v8, %s915_s23  ;;  %s781_s23 = scalar_lea.vmem %s1136_s17, 128 }
  0x78   : > { %p782_p4 = scmp.ne.s32.totalorder %s1136_s17, %s781_s23 }
  0x7a   : > { %542 = vmatpush3.bf16.msra.mxu0 %v911_v1  ;;  %699 = vrot.lane.b32.xlu0 %v678_v8, %s916_s7  ;;  %p783_p7 = pnand %p782_p4, %p1230_p3  ;;  %s787_s7 = scalar_lea.vmem %s786_s16, 256 }
  0x7b   : > { %543 = vmatprep.subr.bf16.mxu0 %v911_v1  ;;  %704 = vrot.lane.b32.xlu1 %v678_v8, %s917_s8  ;;  %p789_p13 = scmp.lt.s32.totalorder %s787_s7, %s781_s23 }
  0x7c   : > { %p784_p9 = pneg %p783_p7 }
  0x7d   : > { %p790_p2 = por %p789_p13, %p788_p11 }
  0x7e   : > { %544 = vmatpush3.bf16.msra.mxu0 %v911_v1  ;;  %709 = vrot.lane.b32.xlu0 %v678_v8, %s920_s29 }
  0x7f   : > { %545 = vmatprep.subr.bf16.mxu0 %v911_v1  ;;  %714 = vrot.lane.b32.xlu1 %v678_v8, %s921_s12  ;;  %p791_p5 = pnand %p790_p2, %p784_p9 }
  0x82   : > { %546 = vmatpush3.bf16.msra.mxu0 %v911_v1  ;;  %719 = vrot.lane.b32.xlu0 %v678_v8, %s922_s20 }
  0x83   : > { %547 = vmatprep.subr.bf16.mxu0 %v911_v1 }
  0xe4   : > { %v680_v10 = vpop.permute.xlu0 %679 }
  0xe5   : > { %v690_v11 = vpop.permute.xlu1 %689  ;;  %v682_v12 = vunpack.i.h.bf16 %v680_v10  ;;  %v681_v13 = vunpack.i.l.bf16 %v680_v10 }
  0xe6   : > { %v692_v14 = vunpack.i.h.bf16 %v690_v11  ;;  %v691_v15 = vunpack.i.l.bf16 %v690_v11 }
  0xe7   : > { %v213_v22 = vsel %vm212_vm1, %v681_v13, %v682_v12  ;;  %vm474_vm1 = vmneg %vm264_vm15 }
  0xe8   : > { %v685_v16 = vpop.permute.xlu0 %684  ;;  %v227_v25 = vsel %vm226_vm2, %v691_v15, %v692_v14  ;;  %vm923_vm2 = vmmov 1  }
  0xe9   : > { %v695_v17 = vpop.permute.xlu1 %694  ;;  %v687_v18 = vunpack.i.h.bf16 %v685_v16  ;;  %v686_v19 = vunpack.i.l.bf16 %v685_v16 }
  0xea   : > { %v697_v20 = vunpack.i.h.bf16 %v695_v17  ;;  %v696_v21 = vunpack.i.l.bf16 %v695_v17 }
  0xeb   : > { %v220_v23 = vsel %vm219_vm3, %v686_v19, %v687_v18  ;;  %vm549_vm3 = vmpackc.low %vm923_vm2, %vm474_vm1 }
  0xec   : > { %v234_v24 = vsel %vm233_vm5, %v696_v21, %v697_v20  ;;  %v267_v26 = vsel %vm266_vm4, %v213_v22, %v220_v23  ;;  %v700_v27 = vpop.permute.xlu0 %699 }
  0xed   : > { %v705_v28 = vpop.permute.xlu1 %704  ;;  %v269_v29 = vsel %vm268_vm6, %v267_v26, %v227_v25  ;;  %v702_v30 = vunpack.i.h.bf16 %v700_v27  ;;  %v701_v31 = vunpack.i.l.bf16 %v700_v27 }
  0xee   : > { %v707_v32 = vunpack.i.h.bf16 %v705_v28  ;;  %v271_v33 = vsel %vm270_vm7, %v269_v29, %v234_v24  ;;  %v706_v34 = vunpack.i.l.bf16 %v705_v28 }
  0xef   : > { %v241_v35 = vsel %vm240_vm8, %v701_v31, %v702_v30 }
  0xf0   : > { %v273_v36 = vsel %vm272_vm9, %v271_v33, %v241_v35  ;;  %v248_v37 = vsel %vm247_vm10, %v706_v34, %v707_v32  ;;  %v710_v38 = vpop.permute.xlu0 %709 }
  0xf1   : > { %v715_v39 = vpop.permute.xlu1 %714  ;;  %v712_v40 = vunpack.i.h.bf16 %v710_v38  ;;  %v711_v41 = vunpack.i.l.bf16 %v710_v38  ;;  %v275_v44 = vsel %vm274_vm11, %v273_v36, %v248_v37 }
  0xf2   : > { %v717_v42 = vunpack.i.h.bf16 %v715_v39  ;;  %v716_v43 = vunpack.i.l.bf16 %v715_v39 }
  0xf3   : > { %v255_v45 = vsel %vm254_vm12, %v711_v41, %v712_v40 }
  0xf4   : > { %v277_v46 = vsel %vm276_vm13, %v275_v44, %v255_v45  ;;  %v262_v47 = vsel %vm261_vm14, %v716_v43, %v717_v42  ;;  %v720_v48 = vpop.permute.xlu0 %719 }
  0xf5   : > { %v722_v49 = vunpack.i.h.bf16 %v720_v48  ;;  %v721_v50 = vunpack.i.l.bf16 %v720_v48  ;;  %v278_v52 = vsel %vm264_vm15, %v277_v46, %v262_v47 }
  0xf7   : > { %v206_v51 = vsel %vm205_vm0, %v721_v50, %v722_v49 }
  0xf8   : > { %v548_v53 = vpack.c.bf16 %v278_v52, %v206_v51 }
  0xfa   : > { %550 = vmatpush3.bf16.msk.msra.mxu0 %vm549_vm3, %v548_v53 }
  0xfd   : > { %531 = vmatmul.mubr.f32.vlgmr.msra.gmra.mrb[0].mxu0 %v279_v54 }
 0x1d0   : > { %v346_v55 = vpop.f32.mrb[0].mxu0 }
 0x1d1   : > { %350 = vst [vmem:[%s186_s30] sm:$0xff] %v346_v55  ;;  %v532_v56 = vpop.f32.mrb[1].mxu0 }
 0x1d2   : > { %794 = shalt.err (!%p791_p5)
}
 0x1d3   : > { %s795_s8 = scalar_lea.hbm %s1141_s24, 128  ;;  %s799_s20 = scalar_lea.hbm %s1203_s2, 768 }
 0x1d4   : > { %p796_p8 = scmp.ne.s32.totalorder %s1141_s24, %s795_s8  ;;  %p800_p10 = scmp.lt.u32.totalorder %s1141_s24, %s1203_s2 }
 0x1d5   : > { %p801_p6 = scmp.lt.u32.totalorder %s799_s20, %s795_s8  ;;  %p803_p4 = scmp.lt.u32.totalorder %s795_s8, %s1141_s24 }
 0x1d6   : > { %p797_p12 = pnand %p796_p8, %p1230_p3 }
 0x1d7   : > { %p802_p1 = por %p801_p6, %p800_p10 }
 0x1d8   : > { %p798_p0 = pneg %p797_p12 }
 0x1d9   : > { %p804_p7 = por %p803_p4, %p802_p1 }
 0x1db   : > { %p805_p9 = pnand %p804_p7, %p798_p0 }
 0x1dd   : > { %808 = shalt.err (!%p805_p9)
}
 0x1de   : > { %558 = dma.vmem_to_hbm [thread:$0]  (%p1230_p3), %s1136_s17, 128, %s1141_s24, %s352_s6  }
 0x1df PF: > { %s1231_s26 = sld [smem:[#allocation12_spill]]  ;;  %p575_p11 = scmp.ge.s32.totalorder %s907_s19, 2 }
 0x1e0   : > { %s379_s3 = sand.u32 1, %s867_s9  }
 0x1e1   : > { %s380_s30 = scalar_lea.sflag [#allocation4], %s379_s3 }
 0x1e5   : > { %p1232_p13 = scmp.ne.s32.totalorder %s1231_s26, 0 }
 0x1e7   : > { %p569_p2 = pnand %p575_p11, %p1232_p13 }
 0x1e9   : > { %862 = dma.done.wait (!%p569_p2), %s380_s30, 128  }
 0x1ea   : > { %864 = vsyncadd (!%p569_p2), %s380_s30, 4294967168  ;;  %s19_s19 = sadd.s32 1, %s907_s19   ;;  %s1233_s15 = sld [smem:[#allocation11_spill]] }
 0x1eb   : > { %p16_p5 = scmp.ge.s32.totalorder %s19_s19, 8   ;;  %s1234_s17 = sld [smem:[#allocation13_spill]] }
 0x1ec   : > { %s1235_s25 = sld [smem:[#allocation14_spill]]  ;;  %s1236_s9 = smov %s871_s10 }
 0x1ed   : > { %s1237_s10 = smov %s875_s11  ;;  %s1238_s11 = smov %s1077_s4 }
 0x1ee   : > { %s1239_s12 = smov %s883_s13  ;;  %s1240_s13 = smov %s887_s14 }
 0x1ef   : > { %s1241_s14 = smov %s1072_s28  ;;  %s1242_s16 = smov %s903_s18 }
 0x1f0   :  { %18 = sbr.rel (!%p16_p5) target bundleno = 12 (0xc), region = 78 }
 0x1f2   : > { %s1243_s18 = smov %s1235_s25 }
 0x1f7   :  { %385 = vsyncpa [#allocation3], 1 }
 0x1f8   :  { %387 = vsyncpa [#allocation3 + $0x1], 1 }
 0x1f9   :  { %388 = vsyncpa [#allocation6], 1 }
 0x1fa   :  { %389 = vsyncpa [#allocation4], 1 }
 0x1fb   :  { %391 = vsyncpa [#allocation4 + $0x1], 1 }

</bundles_post_ra>
